<compile_context>
chip_gen: v6e
topology: v6e:2x2x1
jax: 0.10.0
libtpu: 0.0.40
codegen_flags: <defaults>
</compile_context>

<pallas_src>
import functools

import jax
import jax.numpy as jnp
from jax.experimental import pallas as pl
from jax.experimental.pallas import tpu as pltpu

BN_EPS = 1e-5
_LANE = 128


def _round_up(n, m=_LANE):
    return ((n + m - 1) // m) * m


# ----------------------------------------------------------------------------
# Fused kernel: all Residual blocks + final Linear in one pallas_call
# ----------------------------------------------------------------------------
def _generator_fused_kernel(*refs, layer_out_pads, x_pad, total_pad, inv_batch):
    """refs = [x, (W_i, gamma_i, beta_i)*N, W_out_tile, b_out_tile, out_tile, buf]."""
    n_layers = len(layer_out_pads)
    x_ref = refs[0]
    layer_refs = refs[1:1 + 3 * n_layers]
    w_out_ref = refs[1 + 3 * n_layers]
    b_out_ref = refs[2 + 3 * n_layers]
    out_ref = refs[3 + 3 * n_layers]
    buf_ref = refs[4 + 3 * n_layers]

    # The residual tower runs once; grid axis 0 only tiles the final Linear's
    # output columns.  The bf16 concat buffer persists across grid iterations.
    @pl.when(pl.program_id(0) == 0)
    def _():
        # Buffer layout (concat order of the final layer's input):
        #   [ h_N | ... | h_1 | x0 ]  — every segment padded to a 128 multiple.
        off = total_pad - x_pad
        buf_ref[:, off:] = x_ref[...].astype(jnp.bfloat16)   # lane-dense, once

        o = off
        for li in range(n_layers):                  # unrolled at trace time
            w_ref, gamma_ref, beta_ref = layer_refs[3 * li:3 * li + 3]
            out_pad = layer_out_pads[li]

            xin = buf_ref[:, o:]                    # bf16, lane-aligned suffix
            # Linear (bf16 MXU inputs, f32 accumulate).  The Linear bias is
            # dropped: batch-mean subtraction below cancels it exactly
            # (valid ONLY for training-mode / batch-statistics BatchNorm).
            h = jnp.dot(xin, w_ref[...], preferred_element_type=jnp.float32)

            # BatchNorm1d (training): one-pass sum / sum-of-squares stats in f32.
            sum_h = jnp.sum(h, axis=0, keepdims=True)
            sum_h2 = jnp.sum(h * h, axis=0, keepdims=True)
            mean = sum_h * inv_batch
            var = jnp.maximum(sum_h2 * inv_batch - mean * mean, 0.0)
            scale = gamma_ref[...] * jax.lax.rsqrt(var + BN_EPS)   # [1, out_pad]
            y = (h - mean) * scale + beta_ref[...]
            y = jnp.maximum(y, 0.0)                 # ReLU

            o_new = o - out_pad
            # Invariant: W column pads, gamma pads and beta pads are all zero,
            # so the padded lanes of y are exactly zero and stay zero.
            buf_ref[:, o_new:o] = y.astype(jnp.bfloat16)
            o = o_new
        assert o == 0, "segment offsets must exactly tile the buffer"

    # Final Linear over the full concat buffer, for this output-column tile.
    out_ref[...] = (
        jnp.dot(buf_ref[...], w_out_ref[...], preferred_element_type=jnp.float32)
        + b_out_ref[...]
    )


# ----------------------------------------------------------------------------
# Parameter construction (mirrors the PyTorch module's shapes)
# ----------------------------------------------------------------------------
def init_generator_params(key, embedding_dim, generator_dim, data_dim):
    """Deterministic synthetic parameters matching the PyTorch module's shapes.

    Linear weights are stored pre-transposed as [in_features, out_features].
    """
    params = {"residuals": []}
    dim = embedding_dim
    for item in generator_dim:
        key, kw, kb = jax.random.split(key, 3)
        w = jax.random.normal(kw, (dim, item), jnp.float32) * (1.0 / jnp.sqrt(dim))
        b = jax.random.normal(kb, (1, item), jnp.float32) * 0.01
        gamma = jnp.ones((1, item), jnp.float32)   # BatchNorm1d weight
        beta = jnp.zeros((1, item), jnp.float32)   # BatchNorm1d bias
        params["residuals"].append((w, b, gamma, beta))
        dim += item
    key, kw, kb = jax.random.split(key, 3)
    w_out = jax.random.normal(kw, (dim, data_dim), jnp.float32) * (1.0 / jnp.sqrt(dim))
    b_out = jax.random.normal(kb, (1, data_dim), jnp.float32) * 0.01
    params["final"] = (w_out, b_out)
    return params


def _pad_rows_by_segments(w, seg_sizes, seg_pads):
    """Zero-pad W's rows so each concat segment lands at a 128-aligned offset."""
    parts, r = [], 0
    for s, p in zip(seg_sizes, seg_pads):
        parts.append(w[r:r + s])
        if p > s:
            parts.append(jnp.zeros((p - s, w.shape[1]), w.dtype))
        r += s
    return jnp.concatenate(parts, axis=0)


def _pad_cols(a, target):
    pad = target - a.shape[1]
    if pad > 0:
        a = jnp.concatenate([a, jnp.zeros((a.shape[0], pad), a.dtype)], axis=1)
    return a


def prepare_fused_params(params, embedding_dim, generator_dim, data_dim):
    """One-time preprocessing: lane-pad + bf16-cast weights for the fused kernel."""
    gdims = list(generator_dim)
    x_pad = _round_up(embedding_dim)
    out_pads = [_round_up(g) for g in gdims]
    total_pad = x_pad + sum(out_pads)
    in_pads = [x_pad + sum(out_pads[:i]) for i in range(len(gdims))]

    layers = []
    for i, (w, _b, gamma, beta) in enumerate(params["residuals"]):
        # Row segments of W, in concat order [h_{i-1}, ..., h_0, x0].
        seg_sizes = list(reversed(gdims[:i])) + [embedding_dim]
        seg_pads = list(reversed(out_pads[:i])) + [x_pad]
        w_p = _pad_rows_by_segments(w, seg_sizes, seg_pads)
        w_p = _pad_cols(w_p, out_pads[i]).astype(jnp.bfloat16)
        gamma_p = _pad_cols(gamma, out_pads[i])   # f32 (BN stays in f32)
        beta_p = _pad_cols(beta, out_pads[i])
        # NOTE: the Linear bias `_b` is intentionally not used by the kernel;
        # training-mode BatchNorm's batch-mean subtraction cancels it exactly.
        layers.append((w_p, gamma_p, beta_p))

    w_out, b_out = params["final"]
    dout_pad = _round_up(data_dim)
    seg_sizes = list(reversed(gdims)) + [embedding_dim]
    seg_pads = list(reversed(out_pads)) + [x_pad]
    w_out_p = _pad_cols(_pad_rows_by_segments(w_out, seg_sizes, seg_pads),
                        dout_pad).astype(jnp.bfloat16)
    b_out_p = _pad_cols(b_out, dout_pad)

    # Final-Linear output-column tile: 256 (fills v6e/v7x MXU width) when it
    # divides dout_pad, else 128.
    tn = 256 if dout_pad % 256 == 0 else 128

    return {
        "layers": layers, "w_out": w_out_p, "b_out": b_out_p,
        "x_pad": x_pad, "out_pads": tuple(out_pads), "in_pads": tuple(in_pads),
        "total_pad": total_pad, "data_dim": data_dim, "dout_pad": dout_pad,
        "embedding_dim": embedding_dim, "tn": tn,
    }


def _compute_vmem_limit(fused, batch):
    """Explicit scoped-VMEM budget (bytes): actual footprint + headroom, clamped."""
    x_pad = fused["x_pad"]
    total_pad = fused["total_pad"]
    tn = fused["tn"]
    need = 0
    need += 2 * batch * x_pad * 4                                  # x (f32, dbl-buf)
    for in_pad, out_pad in zip(fused["in_pads"], fused["out_pads"]):
        need += 2 * (in_pad * out_pad * 2 + 2 * out_pad * 4)       # W bf16 + gamma/beta f32
    need += 2 * (total_pad * tn * 2 + tn * 4)                      # W_out / b_out tiles
    need += 2 * batch * tn * 4                                     # out tile (f32)
    need += batch * total_pad * 2                                  # persistent bf16 concat buf
    need = int(need * 1.25) + (2 << 20)                            # headroom
    try:
        cap = int(getattr(pltpu.get_tpu_info(), "vmem_capacity_bytes", 64 << 20))
    except Exception:  # pragma: no cover - conservative fallback (v7x floor)
        cap = 64 << 20
    return max(1 << 20, min(need, int(cap * 0.9)))


# ----------------------------------------------------------------------------
# Forward pass: one fused pallas_call (grid tiles the final Linear's columns)
# ----------------------------------------------------------------------------
def generator_forward(fused, x):
    batch, e = x.shape
    assert e == fused["embedding_dim"]
    x_pad = fused["x_pad"]
    total_pad = fused["total_pad"]
    dout_pad = fused["dout_pad"]
    tn = fused["tn"]
    n_tiles = dout_pad // tn

    if e < x_pad:
        x = jnp.pad(x, ((0, 0), (0, x_pad - e)))   # lane-pad the input once

    kernel = functools.partial(
        _generator_fused_kernel,
        layer_out_pads=fused["out_pads"],
        x_pad=x_pad,
        total_pad=total_pad,
        inv_batch=1.0 / batch,
    )

    inputs = [x]
    in_specs = [pl.BlockSpec((batch, x_pad), lambda j: (0, 0))]
    for (w_p, gamma_p, beta_p), in_pad, out_pad in zip(
            fused["layers"], fused["in_pads"], fused["out_pads"]):
        inputs += [w_p, gamma_p, beta_p]
        in_specs += [
            pl.BlockSpec((in_pad, out_pad), lambda j: (0, 0)),
            pl.BlockSpec((1, out_pad), lambda j: (0, 0)),
            pl.BlockSpec((1, out_pad), lambda j: (0, 0)),
        ]
    inputs += [fused["w_out"], fused["b_out"]]
    in_specs += [
        pl.BlockSpec((total_pad, tn), lambda j: (0, j)),   # W_out column tiles
        pl.BlockSpec((1, tn), lambda j: (0, j)),
    ]
    out_spec = pl.BlockSpec((batch, tn), lambda j: (0, j))

    out = pl.pallas_call(
        kernel,
        out_shape=jax.ShapeDtypeStruct((batch, dout_pad), jnp.float32),
        grid_spec=pltpu.PrefetchScalarGridSpec(
            num_scalar_prefetch=0,
            grid=(n_tiles,),
            in_specs=in_specs,
            out_specs=out_spec,
            scratch_shapes=[pltpu.VMEM((batch, total_pad), jnp.bfloat16)],
        ),
        compiler_params=pltpu.CompilerParams(
            # Sequential: the j==0 step fills the concat buffer used by all tiles.
            dimension_semantics=("arbitrary",),
            vmem_limit_bytes=_compute_vmem_limit(fused, batch),
        ),
    )(*inputs)

    return out[:, :fused["data_dim"]]


# ----------------------------------------------------------------------------
# Pure-JAX reference (PyTorch semantics; same bf16 MXU input precision)
# ----------------------------------------------------------------------------
def generator_reference(params, x):
    for (w, b, gamma, beta) in params["residuals"]:
        h = jnp.dot(x.astype(jnp.bfloat16), w.astype(jnp.bfloat16),
                    preferred_element_type=jnp.float32) + b
        mean = jnp.mean(h, axis=0, keepdims=True)
        var = jnp.mean((h - mean) ** 2, axis=0, keepdims=True)
        h = (h - mean) * jax.lax.rsqrt(var + BN_EPS) * gamma + beta
        h = jnp.maximum(h, 0.0)
        x = jnp.concatenate([h, x], axis=1)
    w_out, b_out = params["final"]
    return jnp.dot(x.astype(jnp.bfloat16), w_out.astype(jnp.bfloat16),
                   preferred_element_type=jnp.float32) + b_out


if __name__ == "__main__":
    batch = 8
    embedding_dim = 32
    generator_dim = (32, 64)
    data_dim = 16

    key = jax.random.PRNGKey(0)
    key, kx = jax.random.split(key)
    params = init_generator_params(key, embedding_dim, generator_dim, data_dim)
    fused = prepare_fused_params(params, embedding_dim, generator_dim, data_dim)
    x = jax.random.normal(kx, (batch, embedding_dim), jnp.float32)

    out = generator_forward(fused, x)
    out = jax.block_until_ready(out)

    ref = generator_reference(params, x)
    assert out.shape == (batch, data_dim), out.shape
    max_err = float(jnp.max(jnp.abs(out - ref)))
    assert jnp.allclose(out, ref, atol=2e-3, rtol=2e-3), (
        f"mismatch vs reference (max abs err {max_err})")

    print("KERNEL_OK")
</pallas_src>

<mosaic_0001>
module attributes {stable_mosaic.version = 11 : i64} {
  func.func @_generator_fused_kernel(%arg0: i32, %arg1: memref<8x128xf32, #tpu.memory_space<vmem>>, %arg2: memref<128x128xbf16, #tpu.memory_space<vmem>>, %arg3: memref<1x128xf32, #tpu.memory_space<vmem>>, %arg4: memref<1x128xf32, #tpu.memory_space<vmem>>, %arg5: memref<256x128xbf16, #tpu.memory_space<vmem>>, %arg6: memref<1x128xf32, #tpu.memory_space<vmem>>, %arg7: memref<1x128xf32, #tpu.memory_space<vmem>>, %arg8: memref<384x128xbf16, #tpu.memory_space<vmem>>, %arg9: memref<1x128xf32, #tpu.memory_space<vmem>>, %arg10: memref<8x128xf32, #tpu.memory_space<vmem>>, %arg11: memref<8x384xbf16, #tpu.memory_space<vmem>>) attributes {dimension_semantics = [#tpu.dimension_semantics<arbitrary>], iteration_bounds = array<i64: 1>, scalar_prefetch = 0 : i64, scratch_operands = 1 : i64, tpu.core_type = #tpu.core_type<tc>, window_params = [{pipeline_mode = #tpu.pipeline_mode<synchronous>, transform_indices = @transform_0, window_bounds = array<i64: 8, 128>}, {pipeline_mode = #tpu.pipeline_mode<synchronous>, transform_indices = @transform_1, window_bounds = array<i64: 128, 128>}, {pipeline_mode = #tpu.pipeline_mode<synchronous>, transform_indices = @transform_2, window_bounds = array<i64: 1, 128>}, {pipeline_mode = #tpu.pipeline_mode<synchronous>, transform_indices = @transform_3, window_bounds = array<i64: 1, 128>}, {pipeline_mode = #tpu.pipeline_mode<synchronous>, transform_indices = @transform_4, window_bounds = array<i64: 256, 128>}, {pipeline_mode = #tpu.pipeline_mode<synchronous>, transform_indices = @transform_5, window_bounds = array<i64: 1, 128>}, {pipeline_mode = #tpu.pipeline_mode<synchronous>, transform_indices = @transform_6, window_bounds = array<i64: 1, 128>}, {transform_indices = @transform_7, window_bounds = array<i64: 384, 128>}, {transform_indices = @transform_8, window_bounds = array<i64: 1, 128>}, {transform_indices = @transform_9, window_bounds = array<i64: 8, 128>}]} {
    %c0_i32 = arith.constant 0 : i32
    %0 = arith.cmpi eq, %arg0, %c0_i32 : i32
    %1 = arith.extui %0 : i1 to i32
    %c0_i32_0 = arith.constant 0 : i32
    %2 = arith.cmpi ne, %1, %c0_i32_0 : i32
    scf.if %2 {
      %c0_8 = arith.constant 0 : index
      %c0_9 = arith.constant 0 : index
      %10 = vector.load %arg1[%c0_8, %c0_9] : memref<8x128xf32, #tpu.memory_space<vmem>>, vector<8x128xf32>
      %11 = arith.truncf %10 : vector<8x128xf32> to vector<8x128xbf16>
      %c0_10 = arith.constant 0 : index
      %c256 = arith.constant 256 : index
      %12 = vector.load %arg11[%c0_10, %c256] : memref<8x384xbf16, #tpu.memory_space<vmem>>, vector<8x128xbf16>
      tpu.vector_store %arg11[%c0_10, %c256], %11 {strides = array<i32>} : memref<8x384xbf16, #tpu.memory_space<vmem>>, vector<8x128xbf16>,
      %c0_11 = arith.constant 0 : index
      %c256_12 = arith.constant 256 : index
      %13 = vector.load %arg11[%c0_11, %c256_12] : memref<8x384xbf16, #tpu.memory_space<vmem>>, vector<8x128xbf16>
      %c0_13 = arith.constant 0 : index
      %c0_14 = arith.constant 0 : index
      %14 = vector.load %arg2[%c0_13, %c0_14] : memref<128x128xbf16, #tpu.memory_space<vmem>>, vector<128x128xbf16>
      %cst_15 = arith.constant dense<0.000000e+00> : vector<8x128xf32>
      %15 = tpu.matmul %13, %14, %cst_15 {dimension_numbers = #tpu.dot_dimension_numbers<[1], [0], [0], [1], [0, 0, 1, 1], [], []>} : vector<8x128xbf16>, vector<128x128xbf16>, vector<8x128xf32> -> vector<8x128xf32>
      %cst_16 = arith.constant dense<0.000000e+00> : vector<128xf32>
      %16 = vector.multi_reduction <add>, %15, %cst_16 [0] : vector<8x128xf32> to vector<128xf32>
      %17 = vector.shape_cast %16 : vector<128xf32> to vector<1x128xf32>
      %18 = arith.mulf %15, %15 : vector<8x128xf32>
      %cst_17 = arith.constant dense<0.000000e+00> : vector<128xf32>
      %19 = vector.multi_reduction <add>, %18, %cst_17 [0] : vector<8x128xf32> to vector<128xf32>
      %20 = vector.shape_cast %19 : vector<128xf32> to vector<1x128xf32>
      %cst_18 = arith.constant 1.250000e-01 : f32
      %21 = vector.broadcast %cst_18 : f32 to vector<1x128xf32>
      %22 = arith.mulf %17, %21 : vector<1x128xf32>
      %cst_19 = arith.constant 1.250000e-01 : f32
      %23 = vector.broadcast %cst_19 : f32 to vector<1x128xf32>
      %24 = arith.mulf %20, %23 : vector<1x128xf32>
      %25 = arith.mulf %22, %22 : vector<1x128xf32>
      %26 = arith.subf %24, %25 : vector<1x128xf32>
      %cst_20 = arith.constant 0.000000e+00 : f32
      %27 = vector.broadcast %cst_20 : f32 to vector<1x128xf32>
      %28 = arith.maximumf %26, %27 : vector<1x128xf32>
      %c0_21 = arith.constant 0 : index
      %c0_22 = arith.constant 0 : index
      %29 = vector.load %arg3[%c0_21, %c0_22] : memref<1x128xf32, #tpu.memory_space<vmem>>, vector<1x128xf32>
      %cst_23 = arith.constant 9.99999974E-6 : f32
      %30 = vector.broadcast %cst_23 : f32 to vector<1x128xf32>
      %31 = arith.addf %28, %30 : vector<1x128xf32>
      %32 = math.rsqrt %31 : vector<1x128xf32>
      %33 = arith.mulf %29, %32 : vector<1x128xf32>
      %34 = vector.broadcast %22 : vector<1x128xf32> to vector<8x128xf32>
      %35 = arith.subf %15, %34 : vector<8x128xf32>
      %36 = vector.broadcast %33 : vector<1x128xf32> to vector<8x128xf32>
      %37 = arith.mulf %35, %36 : vector<8x128xf32>
      %c0_24 = arith.constant 0 : index
      %c0_25 = arith.constant 0 : index
      %38 = vector.load %arg4[%c0_24, %c0_25] : memref<1x128xf32, #tpu.memory_space<vmem>>, vector<1x128xf32>
      %39 = vector.broadcast %38 : vector<1x128xf32> to vector<8x128xf32>
      %40 = arith.addf %37, %39 : vector<8x128xf32>
      %cst_26 = arith.constant 0.000000e+00 : f32
      %41 = vector.broadcast %cst_26 : f32 to vector<8x128xf32>
      %42 = arith.maximumf %40, %41 : vector<8x128xf32>
      %43 = arith.truncf %42 : vector<8x128xf32> to vector<8x128xbf16>
      %c0_27 = arith.constant 0 : index
      %c128 = arith.constant 128 : index
      %44 = vector.load %arg11[%c0_27, %c128] : memref<8x384xbf16, #tpu.memory_space<vmem>>, vector<8x128xbf16>
      tpu.vector_store %arg11[%c0_27, %c128], %43 {strides = array<i32>} : memref<8x384xbf16, #tpu.memory_space<vmem>>, vector<8x128xbf16>,
      %c0_28 = arith.constant 0 : index
      %c128_29 = arith.constant 128 : index
      %45 = vector.load %arg11[%c0_28, %c128_29] : memref<8x384xbf16, #tpu.memory_space<vmem>>, vector<8x256xbf16>
      %c0_30 = arith.constant 0 : index
      %c0_31 = arith.constant 0 : index
      %46 = vector.load %arg5[%c0_30, %c0_31] : memref<256x128xbf16, #tpu.memory_space<vmem>>, vector<256x128xbf16>
      %cst_32 = arith.constant dense<0.000000e+00> : vector<8x128xf32>
      %47 = tpu.matmul %45, %46, %cst_32 {dimension_numbers = #tpu.dot_dimension_numbers<[1], [0], [0], [1], [0, 0, 1, 1], [], []>} : vector<8x256xbf16>, vector<256x128xbf16>, vector<8x128xf32> -> vector<8x128xf32>
      %cst_33 = arith.constant dense<0.000000e+00> : vector<128xf32>
      %48 = vector.multi_reduction <add>, %47, %cst_33 [0] : vector<8x128xf32> to vector<128xf32>
      %49 = vector.shape_cast %48 : vector<128xf32> to vector<1x128xf32>
      %50 = arith.mulf %47, %47 : vector<8x128xf32>
      %cst_34 = arith.constant dense<0.000000e+00> : vector<128xf32>
      %51 = vector.multi_reduction <add>, %50, %cst_34 [0] : vector<8x128xf32> to vector<128xf32>
      %52 = vector.shape_cast %51 : vector<128xf32> to vector<1x128xf32>
      %cst_35 = arith.constant 1.250000e-01 : f32
      %53 = vector.broadcast %cst_35 : f32 to vector<1x128xf32>
      %54 = arith.mulf %49, %53 : vector<1x128xf32>
      %cst_36 = arith.constant 1.250000e-01 : f32
      %55 = vector.broadcast %cst_36 : f32 to vector<1x128xf32>
      %56 = arith.mulf %52, %55 : vector<1x128xf32>
      %57 = arith.mulf %54, %54 : vector<1x128xf32>
      %58 = arith.subf %56, %57 : vector<1x128xf32>
      %cst_37 = arith.constant 0.000000e+00 : f32
      %59 = vector.broadcast %cst_37 : f32 to vector<1x128xf32>
      %60 = arith.maximumf %58, %59 : vector<1x128xf32>
      %c0_38 = arith.constant 0 : index
      %c0_39 = arith.constant 0 : index
      %61 = vector.load %arg6[%c0_38, %c0_39] : memref<1x128xf32, #tpu.memory_space<vmem>>, vector<1x128xf32>
      %cst_40 = arith.constant 9.99999974E-6 : f32
      %62 = vector.broadcast %cst_40 : f32 to vector<1x128xf32>
      %63 = arith.addf %60, %62 : vector<1x128xf32>
      %64 = math.rsqrt %63 : vector<1x128xf32>
      %65 = arith.mulf %61, %64 : vector<1x128xf32>
      %66 = vector.broadcast %54 : vector<1x128xf32> to vector<8x128xf32>
      %67 = arith.subf %47, %66 : vector<8x128xf32>
      %68 = vector.broadcast %65 : vector<1x128xf32> to vector<8x128xf32>
      %69 = arith.mulf %67, %68 : vector<8x128xf32>
      %c0_41 = arith.constant 0 : index
      %c0_42 = arith.constant 0 : index
      %70 = vector.load %arg7[%c0_41, %c0_42] : memref<1x128xf32, #tpu.memory_space<vmem>>, vector<1x128xf32>
      %71 = vector.broadcast %70 : vector<1x128xf32> to vector<8x128xf32>
      %72 = arith.addf %69, %71 : vector<8x128xf32>
      %cst_43 = arith.constant 0.000000e+00 : f32
      %73 = vector.broadcast %cst_43 : f32 to vector<8x128xf32>
      %74 = arith.maximumf %72, %73 : vector<8x128xf32>
      %75 = arith.truncf %74 : vector<8x128xf32> to vector<8x128xbf16>
      %c0_44 = arith.constant 0 : index
      %c0_45 = arith.constant 0 : index
      %76 = vector.load %arg11[%c0_44, %c0_45] : memref<8x384xbf16, #tpu.memory_space<vmem>>, vector<8x128xbf16>
      tpu.vector_store %arg11[%c0_44, %c0_45], %75 {strides = array<i32>} : memref<8x384xbf16, #tpu.memory_space<vmem>>, vector<8x128xbf16>,
    } else {
    }
    %c0 = arith.constant 0 : index
    %c0_1 = arith.constant 0 : index
    %3 = vector.load %arg11[%c0, %c0_1] : memref<8x384xbf16, #tpu.memory_space<vmem>>, vector<8x384xbf16>
    %c0_2 = arith.constant 0 : index
    %c0_3 = arith.constant 0 : index
    %4 = vector.load %arg8[%c0_2, %c0_3] : memref<384x128xbf16, #tpu.memory_space<vmem>>, vector<384x128xbf16>
    %cst = arith.constant dense<0.000000e+00> : vector<8x128xf32>
    %5 = tpu.matmul %3, %4, %cst {dimension_numbers = #tpu.dot_dimension_numbers<[1], [0], [0], [1], [0, 0, 1, 1], [], []>} : vector<8x384xbf16>, vector<384x128xbf16>, vector<8x128xf32> -> vector<8x128xf32>
    %c0_4 = arith.constant 0 : index
    %c0_5 = arith.constant 0 : index
    %6 = vector.load %arg9[%c0_4, %c0_5] : memref<1x128xf32, #tpu.memory_space<vmem>>, vector<1x128xf32>
    %7 = vector.broadcast %6 : vector<1x128xf32> to vector<8x128xf32>
    %8 = arith.addf %5, %7 : vector<8x128xf32>
    %c0_6 = arith.constant 0 : index
    %c0_7 = arith.constant 0 : index
    %9 = vector.load %arg10[%c0_6, %c0_7] : memref<8x128xf32, #tpu.memory_space<vmem>>, vector<8x128xf32>
    tpu.vector_store %arg10[%c0_6, %c0_7], %8 {strides = array<i32>} : memref<8x128xf32, #tpu.memory_space<vmem>>, vector<8x128xf32>,
    return
  }
  func.func @transform_0(%arg0: i32) -> (i32, i32) {
    %c0_i32 = arith.constant 0 : i32
    %c0_i32_0 = arith.constant 0 : i32
    %c0_i32_1 = arith.constant 0 : i32
    return %c0_i32, %c0_i32_0 : i32, i32
  }
  func.func @transform_1(%arg0: i32) -> (i32, i32) {
    %c0_i32 = arith.constant 0 : i32
    %c0_i32_0 = arith.constant 0 : i32
    %c0_i32_1 = arith.constant 0 : i32
    return %c0_i32, %c0_i32_0 : i32, i32
  }
  func.func @transform_2(%arg0: i32) -> (i32, i32) {
    %c0_i32 = arith.constant 0 : i32
    %c0_i32_0 = arith.constant 0 : i32
    %c0_i32_1 = arith.constant 0 : i32
    return %c0_i32, %c0_i32_0 : i32, i32
  }
  func.func @transform_3(%arg0: i32) -> (i32, i32) {
    %c0_i32 = arith.constant 0 : i32
    %c0_i32_0 = arith.constant 0 : i32
    %c0_i32_1 = arith.constant 0 : i32
    return %c0_i32, %c0_i32_0 : i32, i32
  }
  func.func @transform_4(%arg0: i32) -> (i32, i32) {
    %c0_i32 = arith.constant 0 : i32
    %c0_i32_0 = arith.constant 0 : i32
    %c0_i32_1 = arith.constant 0 : i32
    return %c0_i32, %c0_i32_0 : i32, i32
  }
  func.func @transform_5(%arg0: i32) -> (i32, i32) {
    %c0_i32 = arith.constant 0 : i32
    %c0_i32_0 = arith.constant 0 : i32
    %c0_i32_1 = arith.constant 0 : i32
    return %c0_i32, %c0_i32_0 : i32, i32
  }
  func.func @transform_6(%arg0: i32) -> (i32, i32) {
    %c0_i32 = arith.constant 0 : i32
    %c0_i32_0 = arith.constant 0 : i32
    %c0_i32_1 = arith.constant 0 : i32
    return %c0_i32, %c0_i32_0 : i32, i32
  }
  func.func @transform_7(%arg0: i32) -> (i32, i32) {
    %c0_i32 = arith.constant 0 : i32
    %c0_i32_0 = arith.constant 0 : i32
    return %c0_i32, %arg0 : i32, i32
  }
  func.func @transform_8(%arg0: i32) -> (i32, i32) {
    %c0_i32 = arith.constant 0 : i32
    %c0_i32_0 = arith.constant 0 : i32
    return %c0_i32, %arg0 : i32, i32
  }
  func.func @transform_9(%arg0: i32) -> (i32, i32) {
    %c0_i32 = arith.constant 0 : i32
    %c0_i32_0 = arith.constant 0 : i32
    return %c0_i32, %arg0 : i32, i32
  }
}

</mosaic_0001>

<bundles_post_ra>
// kernel: tpu_custom_call.1
= control target key start
LH: loop header
LB: loop body
LE: loop exit
PB: predicated region body
PF: predicated region fallthrough
CT: control target
= control target key end

     0   :  { %14 = vsyncpa [#allocation4], 0  ;;  %s1224_s0 = inlined_call_operand.hbm [shape: f32[8,128], index: 0, kind: input, shape index: {}]   ;;  %s1225_s1 = inlined_call_operand.hbm [shape: bf16[128,128], index: 1, kind: input, shape index: {}]   ;;  %s1226_s2 = inlined_call_operand.vmem [shape: f32[1,128], index: 2, kind: input, shape index: {}]   ;;  %s1227_s3 = inlined_call_operand.vmem [shape: f32[1,128], index: 3, kind: input, shape index: {}]   ;;  %s1228_s4 = inlined_call_operand.hbm [shape: bf16[256,128], index: 4, kind: input, shape index: {}]   ;;  %s1229_s5 = inlined_call_operand.vmem [shape: f32[1,128], index: 5, kind: input, shape index: {}]   ;;  %s1230_s6 = inlined_call_operand.vmem [shape: f32[1,128], index: 6, kind: input, shape index: {}]   ;;  %s1231_s7 = inlined_call_operand.hbm [shape: bf16[384,128], index: 7, kind: input, shape index: {}]   ;;  %s1232_s8 = inlined_call_operand.vmem [shape: f32[1,128], index: 8, kind: input, shape index: {}]   ;;  %s1233_s9 = inlined_call_operand.hbm [shape: f32[8,128], index: 9, kind: output, shape index: {}]  }
   0x1   :  { %15 = vsyncpa [#allocation7], 0 }
   0x2   :  { %16 = vsyncpa [#allocation10], 0 }
   0x3   :  { %17 = vsyncpa [#allocation5], 0  ;;  %s1099_s30 = smov [#allocation6]  }
   0x4   :  { %s33_s10 = sshll.u32 %s1099_s30, 4  ;;  %s34_s10 = int_to_ptr.vmem [resolvable:$true] %s33_s10 }
   0x5   :  { %s999_s11 = scalar_lea.vmem %s34_s10, 1024  ;;  %p1004_p1 = scmp.lt.s32.totalorder %s34_s10, %s34_s10 }
   0x6   :  { %p1000_p0 = scmp.ne.s32.totalorder %s34_s10, %s999_s11  ;;  %p1005_p2 = scmp.lt.s32.totalorder %s999_s11, %s999_s11 }
   0x8   :  { %p1006_p3 = por %p1005_p2, %p1004_p1 }
   0xa   :  { %p1007_p4 = pnand %p1006_p3, %p1000_p0 }
   0xc   :  { %1010 = shalt.err (!%p1007_p4)
}
   0xd   :  { %s1100_s12 = smov 64   ;;  %s1101_s13 = smov 4  }
   0xe   :  { %39 = dma.hbm_to_vmem [thread:$0]  %s1225_s1, 1024, %s34_s10, [#allocation7], %s1100_s12, %s1100_s12, %s1101_s13  }
   0xf   :  { %s1102_s16 = smov [#allocation3]   ;;  %s1103_s18 = smov [#allocation8]  }
  0x10   :  { %s24_s17 = sshll.u32 %s1102_s16, 4  ;;  %s49_s19 = sshll.u32 %s1103_s18, 4  ;;  %s25_s17 = int_to_ptr.vmem [resolvable:$true] %s24_s17  ;;  %s50_s19 = int_to_ptr.vmem [resolvable:$true] %s49_s19 }
  0x11   :  { %s1019_s20 = scalar_lea.vmem %s25_s17, 128  ;;  %p1024_p6 = scmp.lt.s32.totalorder %s25_s17, %s25_s17 }
  0x12   :  { %p1020_p5 = scmp.ne.s32.totalorder %s25_s17, %s1019_s20  ;;  %p1025_p7 = scmp.lt.s32.totalorder %s1019_s20, %s1019_s20 }
  0x14   :  { %p1026_p8 = por %p1025_p7, %p1024_p6 }
  0x16   :  { %p1027_p9 = pnand %p1026_p8, %p1020_p5 }
  0x18   :  { %1030 = shalt.err (!%p1027_p9)
}
  0x19   :  { %27 = dma.hbm_to_vmem [thread:$0]  %s1224_s0, 128, %s25_s17, [#allocation4]  }
  0x1a   :  { %s1039_s23 = scalar_lea.vmem %s50_s19, 2048  ;;  %p1044_p11 = scmp.lt.s32.totalorder %s50_s19, %s50_s19 }
  0x1b   :  { %p1040_p10 = scmp.ne.s32.totalorder %s50_s19, %s1039_s23  ;;  %p1045_p12 = scmp.lt.s32.totalorder %s1039_s23, %s1039_s23 }
  0x1d   :  { %p1046_p13 = por %p1045_p12, %p1044_p11 }
  0x1f   :  { %p1047_p0 = pnand %p1046_p13, %p1040_p10 }
  0x21   :  { %1050 = shalt.err (!%p1047_p0)
}
  0x22   :  { %55 = dma.hbm_to_vmem [thread:$0]  %s1228_s4, 2048, %s50_s19, [#allocation7], %s1100_s12, %s1100_s12, %s1101_s13  }
  0x23   :  { %s1104_s25 = smov [#allocation9]  }
  0x24   :  { %s65_s26 = sshll.u32 %s1104_s25, 4  ;;  %s66_s26 = int_to_ptr.vmem [resolvable:$true] %s65_s26 }
  0x25   :  { %s1059_s27 = scalar_lea.vmem %s66_s26, 3072  ;;  %p1064_p2 = scmp.lt.s32.totalorder %s66_s26, %s66_s26 }
  0x26   :  { %p1060_p1 = scmp.ne.s32.totalorder %s66_s26, %s1059_s27  ;;  %p1065_p3 = scmp.lt.s32.totalorder %s1059_s27, %s1059_s27 }
  0x28   :  { %p1066_p4 = por %p1065_p3, %p1064_p2 }
  0x2a   :  { %p1067_p5 = pnand %p1066_p4, %p1060_p1 }
  0x2c   :  { %1070 = shalt.err (!%p1067_p5)
}
  0x2d   :  { %71 = dma.hbm_to_vmem [thread:$0]  %s1231_s7, 3072, %s66_s26, [#allocation10], %s1100_s12, %s1100_s12, %s1101_s13  }
  0x2e   :  { %1091 = dma.done.wait [#allocation4], 128  }
  0x2f   :  { %1092 = vsyncadd [#allocation4], 4294967168 }
  0x30   :  { %1093 = dma.done.wait [#allocation7], 3072  }
  0x31   :  { %1094 = vsyncadd [#allocation7], 4294964224 }
  0x32   :  { %1095 = dma.done.wait [#allocation10], 3072  }
  0x33   :  { %1096 = vsyncadd [#allocation10], 4294964224  ;;  %v1105_v0 = vmov 0.0   ;;  %vm1106_vm0 = vmmov 0   ;;  %v934_v1 = vld [vmem:[#allocation6 + $0x38] sm:$0xff]   ;;  %v935_v2 = vld [vmem:[#allocation6 + $0x30] sm:$0xff]   ;;  %v223_v51 = vlaneseq }
  0x34   :  { %885 = vmatprep.subr.bf16.mxu0 %v1105_v0  ;;  %901 = vmatprep.mubr.msk.bf16.mxu0 %vm1106_vm0, %v1105_v0  ;;  %v936_v3 = vld [vmem:[#allocation6 + $0x28] sm:$0xff]   ;;  %v937_v4 = vld [vmem:[#allocation6 + $0x20] sm:$0xff]   ;;  %v91_v5 = vld [vmem:[#allocation3] sm:$0xff] }
  0x35   :  { %886 = vmatpush3.bf16.msra.mxu0 %v934_v1  ;;  %v92_v6 = vpack.c.bf16 %v91_v5, %v91_v5  ;;  %v938_v7 = vld [vmem:[#allocation6 + $0x18] sm:$0xff]   ;;  %v939_v8 = vld [vmem:[#allocation6 + $0x10] sm:$0xff]   ;;  %v940_v9 = vld [vmem:[#allocation6 + $0x8] sm:$0xff]   ;;  %v1190_v52 = vshrl.u32 %v223_v51, 7 }
  0x36   :  { %887 = vmatprep.subr.bf16.mxu0 %v1105_v0  ;;  %v941_v10 = vld [vmem:[#allocation6] sm:$0xff]   ;;  %v942_v12 = vld [vmem:[#allocation8 + $0x78] sm:$0xff]   ;;  %v944_v14 = vld [vmem:[#allocation8 + $0x70] sm:$0xff]  }
  0x37   :  { %93 = vst [vmem:[#allocation2 + $0x8] sm:$0xf] %v92_v6  ;;  %v943_v13 = vld [vmem:[#allocation8 + $0x38] sm:$0xff]   ;;  %832 = vmatprep.subr.bf16.mxu1 %v942_v12  ;;  %v945_v15 = vld [vmem:[#allocation8 + $0x30] sm:$0xff]   ;;  %v946_v16 = vld [vmem:[#allocation8 + $0x68] sm:$0xff]   ;;  %v225_v54 = vsub.s32 0, %v1190_v52 }
  0x38   :  { %833 = vmatpush3.bf16.msra.mxu1 %v943_v13  ;;  %v947_v17 = vld [vmem:[#allocation8 + $0x28] sm:$0xff]   ;;  %v948_v18 = vld [vmem:[#allocation8 + $0x60] sm:$0xff]   ;;  %v950_v20 = vld [vmem:[#allocation8 + $0x58] sm:$0xff]  }
  0x39   :  { %888 = vmatpush3.bf16.msra.mxu0 %v935_v2  ;;  %834 = vmatprep.subr.bf16.mxu1 %v944_v14  ;;  %v949_v19 = vld [vmem:[#allocation8 + $0x20] sm:$0xff]   ;;  %v951_v21 = vld [vmem:[#allocation8 + $0x18] sm:$0xff]   ;;  %v952_v22 = vld [vmem:[#allocation8 + $0x50] sm:$0xff]  }
  0x3a   :  { %889 = vmatprep.subr.bf16.mxu0 %v1105_v0  ;;  %v953_v23 = vld [vmem:[#allocation8 + $0x10] sm:$0xff]   ;;  %v954_v24 = vld [vmem:[#allocation8 + $0x48] sm:$0xff]   ;;  %v956_v26 = vld [vmem:[#allocation8 + $0x40] sm:$0xff]  }
  0x3b   :  { %v955_v25 = vld [vmem:[#allocation8 + $0x8] sm:$0xff]   ;;  %v957_v27 = vld [vmem:[#allocation8] sm:$0xff]   ;;  %v961_v5 = vld [vmem:[#allocation9 + $0x78] sm:$0xff]  }
  0x3c   :  { %835 = vmatpush3.bf16.msra.mxu1 %v945_v15  ;;  %v217_v53 = vld [vmem:[%s1226_s2] sm:$0x1]  ;;  %v962_v6 = vld [vmem:[#allocation9 + $0x38] sm:$0xff]   ;;  %v969_v13 = vld [vmem:[#allocation9 + $0xa0] sm:$0xff]  }
  0x3d   :  { %890 = vmatpush3.bf16.msra.mxu0 %v936_v3  ;;  %836 = vmatprep.subr.bf16.mxu1 %v946_v16  ;;  %v775_v59 = vld [vmem:[%s1227_s3] ss:$0 sm:$0xff]  ;;  %v970_v14 = vld [vmem:[#allocation9 + $0x60] sm:$0xff]   ;;  %v972_v16 = vld [vmem:[#allocation9 + $0x98] sm:$0xff]  }
  0x3e   :  { %891 = vmatprep.subr.bf16.mxu0 %v1105_v0  ;;  %v94_v11 = vld [vmem:[#allocation2 + $0x8] sm:$0xf]  ;;  %v968_v12 = vld [vmem:[#allocation9 + $0x28] sm:$0xff]   ;;  %v971_v15 = vld [vmem:[#allocation9 + $0x20] sm:$0xff]  }
  0x40   :  { %837 = vmatpush3.bf16.msra.mxu1 %v947_v17  ;;  %v973_v17 = vld [vmem:[#allocation9 + $0x58] sm:$0xff]  }
  0x41   :  { %892 = vmatpush3.bf16.msra.mxu0 %v937_v4  ;;  %838 = vmatprep.subr.bf16.mxu1 %v948_v18  ;;  %v960_v4 = vld [vmem:[#allocation9 + $0xb8] sm:$0xff]  }
  0x42   :  { %893 = vmatprep.subr.bf16.mxu0 %v1105_v0  ;;  %v974_v18 = vld [vmem:[#allocation9 + $0x18] sm:$0xff]  }
  0x44   :  { %839 = vmatpush3.bf16.msra.mxu1 %v949_v19  ;;  %v975_v19 = vld [vmem:[#allocation9 + $0x90] sm:$0xff]  }
  0x45   :  { %894 = vmatpush3.bf16.msra.mxu0 %v938_v7  ;;  %840 = vmatprep.subr.bf16.mxu1 %v950_v20  ;;  %v963_v7 = vld [vmem:[#allocation9 + $0xb0] sm:$0xff]  }
  0x46   :  { %895 = vmatprep.subr.bf16.mxu0 %v1105_v0  ;;  %v976_v20 = vld [vmem:[#allocation9 + $0x50] sm:$0xff]  }
  0x48   :  { %841 = vmatpush3.bf16.msra.mxu1 %v951_v21  ;;  %v977_v21 = vld [vmem:[#allocation9 + $0x10] sm:$0xff]  }
  0x49   :  { %896 = vmatpush3.bf16.msra.mxu0 %v939_v8  ;;  %842 = vmatprep.subr.bf16.mxu1 %v952_v22  ;;  %v964_v8 = vld [vmem:[#allocation9 + $0x70] sm:$0xff]   ;;  %v978_v22 = vld [vmem:[#allocation9 + $0x88] sm:$0xff]  }
  0x4a   :  { %897 = vmatprep.subr.bf16.mxu0 %v1105_v0 }
  0x4c   :  { %843 = vmatpush3.bf16.msra.mxu1 %v953_v23  ;;  %v979_v23 = vld [vmem:[#allocation9 + $0x48] sm:$0xff]  }
  0x4d   :  { %898 = vmatpush3.bf16.msra.mxu0 %v940_v9  ;;  %844 = vmatprep.subr.bf16.mxu1 %v954_v24  ;;  %v965_v9 = vld [vmem:[#allocation9 + $0x30] sm:$0xff]   ;;  %v980_v24 = vld [vmem:[#allocation9 + $0x8] sm:$0xff]  }
  0x4e   :  { %899 = vmatprep.subr.bf16.mxu0 %v1105_v0 }
  0x50   :  { %845 = vmatpush3.bf16.msra.mxu1 %v955_v25  ;;  %v982_v25 = vld [vmem:[#allocation9 + $0x40] sm:$0xff]  }
  0x51   :  { %900 = vmatpush3.bf16.msra.mxu0 %v941_v10  ;;  %846 = vmatprep.subr.bf16.mxu1 %v956_v26  ;;  %v966_v10 = vld [vmem:[#allocation9 + $0xa8] sm:$0xff]   ;;  %v981_v26 = vld [vmem:[#allocation9 + $0x80] sm:$0xff]  }
  0x52   :  { %854 = vmatprep.subr.bf16.mxu0 %v961_v5 }
  0x54   :  { %902 = vmatmul.mubr.bf16.vlgmr.msra.gmra.mxu0 %v94_v11  ;;  %847 = vmatpush3.bf16.msra.mxu1 %v957_v27  ;;  %v967_v11 = vld [vmem:[#allocation9 + $0x68] sm:$0xff]   ;;  %v983_v27 = vld [vmem:[#allocation9] sm:$0xff]  }
  0x55   :  { %905 = vmatprep.subr.bf16.mxu1 %v1105_v0  ;;  %855 = vmatpush3.bf16.msra.mxu0 %v962_v6 }
  0x56   :  { %856 = vmatprep.subr.bf16.mxu0 %v964_v8 }
  0x59   :  { %857 = vmatpush3.bf16.msra.mxu0 %v965_v9 }
  0x5a   :  { %858 = vmatprep.subr.bf16.mxu0 %v967_v11 }
  0x5d   :  { %859 = vmatpush3.bf16.msra.mxu0 %v968_v12 }
  0x5e   :  { %860 = vmatprep.subr.bf16.mxu0 %v970_v14 }
  0x61   :  { %861 = vmatpush3.bf16.msra.mxu0 %v971_v15 }
  0x62   :  { %862 = vmatprep.subr.bf16.mxu0 %v973_v17 }
  0x65   :  { %863 = vmatpush3.bf16.msra.mxu0 %v974_v18 }
  0x66   :  { %864 = vmatprep.subr.bf16.mxu0 %v976_v20 }
  0x69   :  { %865 = vmatpush3.bf16.msra.mxu0 %v977_v21 }
  0x6a   :  { %866 = vmatprep.subr.bf16.mxu0 %v979_v23 }
  0x6d   :  { %867 = vmatpush3.bf16.msra.mxu0 %v980_v24 }
  0x6e   :  { %868 = vmatprep.subr.bf16.mxu0 %v982_v25 }
  0x71   :  { %869 = vmatpush3.bf16.msra.mxu0 %v983_v27 }
 0x114   :  { %v193_v28 = vpop.f32.mrf.mxu0 }
 0x115   :  { %v199_v29 = vrot.slane %v193_v28, 4  ;;  %v205_v30 = vmul.f32 %v193_v28, %v193_v28 }
 0x116   :  { %v903_v31 = vpop.f32.mrf.mxu0 }
 0x117   :  { %v200_v32 = vadd.f32 %v199_v29, %v193_v28  ;;  %v206_v33 = vrot.slane %v205_v30, 4 }
 0x118   :  { %v196_v34 = vpop.f32.mrf.mxu0 }
 0x119   :  { %v201_v35 = vrot.slane %v200_v32, 2  ;;  %v207_v36 = vadd.f32 %v206_v33, %v205_v30 }
 0x11a   :  { %v904_v37 = vpop.f32.mrf.mxu0 }
 0x11b   :  { %v202_v38 = vadd.f32 %v201_v35, %v200_v32  ;;  %v208_v39 = vrot.slane %v207_v36, 2 }
 0x11d   :  { %v203_v40 = vrot.slane %v202_v38, 1  ;;  %v209_v41 = vadd.f32 %v208_v39, %v207_v36 }
 0x11f   :  { %v204_v42 = vadd.f32 %v203_v40, %v202_v38  ;;  %v210_v43 = vrot.slane %v209_v41, 1 }
 0x121   :  { %v211_v44 = vadd.f32 %v210_v43, %v209_v41  ;;  %v212_v45 = vmul.f32 0.125, %v204_v42 }
 0x123   :  { %v213_v46 = vmul.f32 0.125, %v211_v44  ;;  %v214_v47 = vmul.f32 %v212_v45, %v212_v45  ;;  %v221_v57 = vsub.f32 %v193_v28, %v212_v45  ;;  %v984_v28 = vld [vmem:[#allocation2 + $0x8] ss:$0 sps:$4 sm:$0xff]  }
 0x125   :  { %v215_v48 = vsub.f32 %v213_v46, %v214_v47 }
 0x127   :  { %v216_v49 = vmax.f32 %v215_v48, 0.0 }
 0x129   :  { %v218_v50 = vadd.f32 1e-05, %v216_v49 }
 0x12b   :  { %987 = vrsqrt.f32 %v218_v50 }
 0x138   :  { %v988_v55 = vpop.eup %987 }
 0x139   :  { %v220_v56 = vmul.f32 %v988_v55, %v217_v53  ;;  %v434_v53 = vld [vmem:[%s1229_s5] sm:$0x1] }
 0x13b   :  { %v226_v58 = vrot.slane %v220_v56, %v225_v54 }
 0x13d   :  { %v228_v60 = vmul.f32 %v226_v58, %v221_v57 }
 0x13f   :  { %v236_v61 = vadd.f32 %v775_v59, %v228_v60  ;;  %v794_v59 = vld [vmem:[%s1230_s6] ss:$0 sm:$0xff]  ;;  %s1107_s6 = smov [#allocation11]  }
 0x140   :  { %s756_s13 = sshll.u32 %s1107_s6, 4  ;;  %s757_s13 = int_to_ptr.vmem [resolvable:$true] %s756_s13 }
 0x141   :  { %v237_v62 = vmax.f32 %v236_v61, 0.0  ;;  %s1071_s14 = scalar_lea.vmem %s757_s13, 128  ;;  %p1076_p7 = scmp.lt.s32.totalorder %s757_s13, %s757_s13 }
 0x142   :  { %p1072_p6 = scmp.ne.s32.totalorder %s757_s13, %s1071_s14  ;;  %p1077_p8 = scmp.lt.s32.totalorder %s1071_s14, %s1071_s14 }
 0x143   :  { %v238_v63 = vpack.c.bf16 %v237_v62, %v237_v62 }
 0x144   :  { %p1078_p9 = por %p1077_p8, %p1076_p7 }
 0x145   :  { %239 = vst [vmem:[#allocation2 + $0x4] sm:$0xf] %v238_v63 }
 0x146   :  { %p1079_p10 = pnand %p1078_p9, %p1072_p6 }
 0x14c   :  { %v240_v1 = vld [vmem:[#allocation2 + $0x4] sm:$0xff] }
 0x14d   :  { %v776_v2 = vcombine.low %v240_v1, %v240_v1  ;;  %v777_v3 = vcombine.high %v240_v1, %v240_v1 }
 0x14f   :  { %408 = vmatprep.mubr.bf16.mxu1 %v777_v3 }
 0x150   :  { %409 = vmatmul.mubr.bf16.vlgmr.msra.gmra.mxu1 %v776_v2 }
 0x151   :  { %921 = vmatprep.mubr.msk.bf16.mxu1 %vm1106_vm0, %v1105_v0  ;;  %906 = vmatpush3.bf16.msra.mxu1 %v960_v4 }
 0x152   :  { %907 = vmatprep.subr.bf16.mxu1 %v1105_v0 }
 0x155   :  { %908 = vmatpush3.bf16.msra.mxu1 %v963_v7 }
 0x156   :  { %909 = vmatprep.subr.bf16.mxu1 %v1105_v0 }
 0x159   :  { %910 = vmatpush3.bf16.msra.mxu1 %v966_v10 }
 0x15a   :  { %911 = vmatprep.subr.bf16.mxu1 %v1105_v0 }
 0x15d   :  { %912 = vmatpush3.bf16.msra.mxu1 %v969_v13 }
 0x15e   :  { %913 = vmatprep.subr.bf16.mxu1 %v1105_v0 }
 0x161   :  { %914 = vmatpush3.bf16.msra.mxu1 %v972_v16 }
 0x162   :  { %915 = vmatprep.subr.bf16.mxu1 %v1105_v0 }
 0x165   :  { %916 = vmatpush3.bf16.msra.mxu1 %v975_v19 }
 0x166   :  { %917 = vmatprep.subr.bf16.mxu1 %v1105_v0 }
 0x169   :  { %918 = vmatpush3.bf16.msra.mxu1 %v978_v22 }
 0x16a   :  { %919 = vmatprep.subr.bf16.mxu1 %v1105_v0 }
 0x16d   :  { %920 = vmatpush3.bf16.msra.mxu1 %v981_v26 }
 0x170   :  { %922 = vmatmul.mubr.bf16.vlgmr.msra.gmra.mxu1 %v984_v28 }
 0x210   :  { %v848_v29 = vpop.f32.mrf.mxu1 }
 0x212   :  { %v849_v30 = vpop.f32.mrf.mxu1 }
 0x213   :  { %v850_v31 = vadd.f32 %v849_v30, %v848_v29 }
 0x214   :  { %v851_v32 = vpop.f32.mrf.mxu1 }
 0x215   :  { %v416_v33 = vrot.slane %v850_v31, 4  ;;  %v422_v34 = vmul.f32 %v850_v31, %v850_v31 }
 0x216   :  { %v852_v35 = vpop.f32.mrf.mxu1 }
 0x217   :  { %v417_v36 = vadd.f32 %v850_v31, %v416_v33  ;;  %v423_v37 = vrot.slane %v422_v34, 4 }
 0x219   :  { %v418_v38 = vrot.slane %v417_v36, 2  ;;  %v424_v39 = vadd.f32 %v423_v37, %v422_v34 }
 0x21b   :  { %v419_v40 = vadd.f32 %v418_v38, %v417_v36  ;;  %v425_v0 = vrot.slane %v424_v39, 2 }
 0x21d   :  { %v420_v41 = vrot.slane %v419_v40, 1  ;;  %v426_v42 = vadd.f32 %v425_v0, %v424_v39 }
 0x21f   :  { %v421_v43 = vadd.f32 %v420_v41, %v419_v40  ;;  %v427_v44 = vrot.slane %v426_v42, 1 }
 0x221   :  { %v428_v45 = vadd.f32 %v427_v44, %v426_v42  ;;  %v429_v46 = vmul.f32 0.125, %v421_v43 }
 0x223   :  { %v430_v47 = vmul.f32 0.125, %v428_v45  ;;  %v431_v48 = vmul.f32 %v429_v46, %v429_v46  ;;  %v438_v57 = vsub.f32 %v850_v31, %v429_v46 }
 0x225   :  { %v432_v49 = vsub.f32 %v430_v47, %v431_v48 }
 0x227   :  { %v433_v50 = vmax.f32 %v432_v49, 0.0 }
 0x229   :  { %v435_v51 = vadd.f32 1e-05, %v433_v50 }
 0x22b   :  { %989 = vrsqrt.f32 %v435_v51 }
 0x230   :  { %v743_v4 = vpop.f32.mrf.mxu1 }
 0x232   :  { %v923_v5 = vpop.f32.mrf.mxu1 }
 0x234   :  { %v746_v6 = vpop.f32.mrf.mxu1 }
 0x236   :  { %v924_v7 = vpop.f32.mrf.mxu1 }
 0x238   :  { %v990_v55 = vpop.eup %989 }
 0x239   :  { %v437_v56 = vmul.f32 %v990_v55, %v434_v53 }
 0x23b   :  { %v443_v58 = vrot.slane %v437_v56, %v225_v54  ;;  %v795_v54 = vld [vmem:[%s1232_s8] ss:$0 sm:$0xff] }
 0x23d   :  { %v445_v60 = vmul.f32 %v443_v58, %v438_v57 }
 0x23f   :  { %v453_v61 = vadd.f32 %v794_v59, %v445_v60 }
 0x241   :  { %v454_v62 = vmax.f32 %v453_v61, 0.0 }
 0x243   :  { %v455_v63 = vpack.c.bf16 %v454_v62, %v454_v62 }
 0x245   :  { %456 = vst [vmem:[#allocation2] sm:$0xf] %v455_v63 }
 0x24c   :  { %v457_v1 = vld [vmem:[#allocation2] sm:$0xff] }
 0x24d   :  { %v796_v2 = vcombine.low %v457_v1, %v457_v1  ;;  %v797_v3 = vcombine.high %v457_v1, %v457_v1 }
 0x24f   :  { %701 = vmatprep.mubr.bf16.mxu0 %v797_v3 }
 0x250   :  { %702 = vmatmul.mubr.bf16.vlgmr.msra.gmra.mxu0 %v796_v2 }
 0x310   :  { %v870_v52 = vpop.f32.mrf.mxu0 }
 0x312   :  { %v871_v8 = vpop.f32.mrf.mxu0 }
 0x313   :  { %v872_v9 = vadd.f32 %v871_v8, %v870_v52 }
 0x314   :  { %v873_v10 = vpop.f32.mrf.mxu0 }
 0x315   :  { %v704_v11 = vadd.f32 %v872_v9, %v795_v54 }
 0x316   :  { %v874_v12 = vpop.f32.mrf.mxu0 }
 0x317   :  { %v744_v13 = vadd.f32 %v743_v4, %v704_v11 }
 0x319   :  { %749 = vst [vmem:[#allocation11] sm:$0xff] %v744_v13 }
 0x31a   :  { %1082 = shalt.err (!%p1079_p10)
}
 0x31b   :  { %759 = dma.vmem_to_hbm [thread:$0]  %s757_s13, 128, %s1233_s9, [#allocation5]  }
 0x31c   :  { %1097 = dma.done.wait [#allocation5], 128  }
 0x31d   :  { %1098 = vsyncadd [#allocation5], 4294967168 }
 0x31e   :  { %763 = vsyncpa [#allocation4], 1 }
 0x31f   :  { %764 = vsyncpa [#allocation7], 1 }
 0x320   :  { %765 = vsyncpa [#allocation10], 1 }
 0x321   :  { %766 = vsyncpa [#allocation5], 1 }

</bundles_post_ra>
